<compile_context>
chip_gen: v7x
topology: tpu7x:2x2x1
jax: 0.10.0
libtpu: 0.0.40
codegen_flags: <defaults>
</compile_context>

<pallas_src>
import functools

import jax
import jax.numpy as jnp
from jax import lax
from jax.experimental import pallas as pl
from jax.experimental.pallas import tpu as pltpu


def _self_attn_kernel(xq_ref, xkv_ref, wqkv_ref, bqkv_ref, ww_ref, bw_ref,
                      o_ref, *scratch, kc, tk, inv_sqrt_kc, cache_kv):
    if cache_kv:
        q_sc, kv_sc, m_sc, l_sc, acc_sc = scratch
    else:
        q_sc, m_sc, l_sc, acc_sc = scratch
        kv_sc = None

    qi = pl.program_id(1)
    ki = pl.program_id(2)

    wqkv = wqkv_ref[...]                                        # (Kc+Vc, C) bf16
    bqkv = bqkv_ref[...]                                        # (Kc+Vc, 1) f32

    # --- per (batch, q-tile) init: softmax state + query projection --------
    @pl.when(ki == 0)
    def _():
        m_sc[...] = jnp.full(m_sc.shape, -jnp.inf, jnp.float32)
        l_sc[...] = jnp.zeros(l_sc.shape, jnp.float32)
        acc_sc[...] = jnp.zeros(acc_sc.shape, jnp.float32)
        # BN-folded 1x1 conv on the query tile (Kc, Tq), pre-scaled by Kc^-0.5.
        qf = jnp.dot(wqkv[:kc], xq_ref[0],
                     preferred_element_type=jnp.float32) + bqkv[:kc]
        q_sc[...] = (qf * inv_sqrt_kc).astype(jnp.bfloat16)

    # --- key/value projection (Kc+Vc, Tk): computed once per kv tile -------
    if cache_kv:
        off = pl.multiple_of(ki * tk, tk)

        @pl.when(qi == 0)
        def _():
            kvp = jnp.dot(wqkv, xkv_ref[0],
                          preferred_element_type=jnp.float32) + bqkv
            kv_sc[:, pl.ds(off, tk)] = kvp.astype(jnp.bfloat16)

        kv = kv_sc[:, pl.ds(off, tk)]                           # reused for qi > 0
    else:
        kvp = jnp.dot(wqkv, xkv_ref[0],
                      preferred_element_type=jnp.float32) + bqkv
        kv = kvp.astype(jnp.bfloat16)

    q = q_sc[...]                                               # (Kc, Tq) bf16
    k = kv[:kc]                                                 # (Kc, Tk) bf16
    v = kv[kc:]                                                 # (Vc, Tk) bf16

    # --- sim tile (Tk, Tq): contract Kc, no explicit transposes ------------
    s = lax.dot_general(k, q, (((0,), (0,)), ((), ())),
                        preferred_element_type=jnp.float32)

    # --- online softmax over the kv axis (f32 elementwise) -----------------
    m_prev = m_sc[...]                                          # (1, Tq)
    m_new = jnp.maximum(m_prev, jnp.max(s, axis=0, keepdims=True))
    alpha = jnp.exp(m_prev - m_new)
    p = jnp.exp(s - m_new)                                      # (Tk, Tq)
    l_sc[...] = alpha * l_sc[...] + jnp.sum(p, axis=0, keepdims=True)
    ctx = lax.dot_general(v, p.astype(jnp.bfloat16), (((1,), (0,)), ((), ())),
                          preferred_element_type=jnp.float32)   # (Vc, Tq)
    acc_sc[...] = alpha * acc_sc[...] + ctx
    m_sc[...] = m_new

    # --- finalize: normalize + output 1x1 conv, lane-dense (Oc, Tq) store --
    @pl.when(ki == pl.num_programs(2) - 1)
    def _():
        inv_l = pl.reciprocal(l_sc[...], approx=True)           # EUP slot
        ctx_n = (acc_sc[...] * inv_l).astype(jnp.bfloat16)      # (Vc, Tq)
        out = jnp.dot(ww_ref[...], ctx_n,
                      preferred_element_type=jnp.float32)       # (Oc, Tq)
        o_ref[0] = (out + bw_ref[...]).astype(o_ref.dtype)


def _pick_tile(hw, cap=512):
    """Largest spatial tile <= cap that divides HW and is a multiple of 128."""
    if hw <= cap:
        return hw
    for t in range(cap, 127, -128):
        if hw % t == 0:
            return t
    return hw   # fall back to a single full-extent tile


def self_attention_block(x_nchw, params, *, key_channels, value_channels,
                         out_channels, bn_eps=1e-5, tq=None, tk=None,
                         cache_kv=None):
    """Pallas forward of _SelfAttentionBlock (scale=1). Input/Output are NCHW."""
    N, C, H, W = x_nchw.shape
    HW = H * W
    Kc, Vc, Oc = key_channels, value_channels, out_channels

    tq = _pick_tile(HW) if tq is None else tq
    tk = _pick_tile(HW) if tk is None else tk
    assert HW % tq == 0 and HW % tk == 0, "HW must be divisible by tile sizes"

    # Cache projected K/V in VMEM (reused across q-tiles) when it fits a
    # conservative budget; otherwise recompute the projection per kv tile.
    if cache_kv is None:
        cache_kv = (Kc + Vc) * HW * 2 <= 4 * 1024 * 1024

    # ---- plain-JAX glue: layout (no transposes) + BN folding ---------------
    x_tok = x_nchw.reshape(N, C, HW).astype(jnp.bfloat16)       # (N, C, HW)

    gamma, beta = params["bn_gamma"], params["bn_beta"]
    mean, var = params["bn_mean"], params["bn_var"]
    bn_scale = gamma / jnp.sqrt(var + bn_eps)                   # (Kc,)

    wqk = params["w_key"] * bn_scale[:, None]                   # (Kc, C) BN-folded
    bqk = (params["b_key"] - mean) * bn_scale + beta            # (Kc,)
    wqkv = jnp.concatenate([wqk, params["w_value"]], axis=0).astype(jnp.bfloat16)
    bqkv = jnp.concatenate([bqk, params["b_value"]], axis=0)[:, None].astype(jnp.float32)
    ww = params["w_out"].astype(jnp.bfloat16)                   # (Oc, Vc)
    bw = params["b_out"][:, None].astype(jnp.float32)           # (Oc, 1)

    kernel = functools.partial(_self_attn_kernel, kc=Kc, tk=tk,
                               inv_sqrt_kc=float(Kc) ** (-0.5),
                               cache_kv=cache_kv)

    scratch = [pltpu.VMEM((Kc, tq), jnp.bfloat16)]              # projected q tile
    if cache_kv:
        scratch.append(pltpu.VMEM((Kc + Vc, HW), jnp.bfloat16))  # projected K/V cache
    scratch += [
        pltpu.VMEM((1, tq), jnp.float32),                       # running max
        pltpu.VMEM((1, tq), jnp.float32),                       # running denom
        pltpu.VMEM((Vc, tq), jnp.float32),                      # running context acc
    ]

    # With the KV cache, q-tile iterations for a batch must run in order
    # (qi==0 fills the cache), so mark that axis 'arbitrary'.
    dims = (("parallel", "arbitrary", "arbitrary") if cache_kv
            else ("parallel", "parallel", "arbitrary"))

    out_tok = pl.pallas_call(
        kernel,
        out_shape=jax.ShapeDtypeStruct((N, Oc, HW), jnp.float32),
        grid_spec=pltpu.PrefetchScalarGridSpec(
            num_scalar_prefetch=0,
            grid=(N, HW // tq, HW // tk),
            in_specs=[
                pl.BlockSpec((1, C, tq), lambda b, qi, ki: (b, 0, qi)),       # x (query tile)
                pl.BlockSpec((1, C, tk), lambda b, qi, ki: (b, 0, ki)),       # x (kv tile)
                pl.BlockSpec((Kc + Vc, C), lambda b, qi, ki: (0, 0)),         # fused W (qk|v)
                pl.BlockSpec((Kc + Vc, 1), lambda b, qi, ki: (0, 0)),         # fused bias
                pl.BlockSpec((Oc, Vc), lambda b, qi, ki: (0, 0)),             # W (out conv)
                pl.BlockSpec((Oc, 1), lambda b, qi, ki: (0, 0)),              # b (out conv)
            ],
            out_specs=pl.BlockSpec((1, Oc, tq), lambda b, qi, ki: (b, 0, qi)),
            scratch_shapes=scratch,
        ),
        compiler_params=pltpu.CompilerParams(dimension_semantics=dims),
    )(x_tok, x_tok, wqkv, bqkv, ww, bw)

    # (N, Oc, HW) -> NCHW (pure reshape, no transpose)
    return out_tok.reshape(N, Oc, H, W)


def _reference(x_nchw, params, *, key_channels, value_channels, out_channels,
               bn_eps=1e-5):
    """Pure-JAX (f32) mirror of the PyTorch forward (scale=1), for validation."""
    N, C, H, W = x_nchw.shape
    HW = H * W
    x = x_nchw.reshape(N, C, HW).astype(jnp.float32)            # (N, C, HW)

    def conv1x1(feat, w, b):                                    # w: (Co, Ci)
        return jnp.einsum("oc,nci->noi", w, feat) + b[None, :, None]

    kq = conv1x1(x, params["w_key"], params["b_key"])           # (N, Kc, HW)
    bn_scale = params["bn_gamma"] / jnp.sqrt(params["bn_var"] + bn_eps)
    kq = (kq - params["bn_mean"][None, :, None]) * bn_scale[None, :, None] \
         + params["bn_beta"][None, :, None]
    val = conv1x1(x, params["w_value"], params["b_value"])      # (N, Vc, HW)

    query = jnp.transpose(kq, (0, 2, 1))                        # (N, HW, Kc)
    key = kq                                                    # (N, Kc, HW)
    value = jnp.transpose(val, (0, 2, 1))                       # (N, HW, Vc)

    sim = jnp.matmul(query, key) * (key_channels ** -0.5)       # (N, HW, HW)
    sim = jax.nn.softmax(sim, axis=-1)
    ctx = jnp.matmul(sim, value)                                # (N, HW, Vc)
    ctx = jnp.transpose(ctx, (0, 2, 1))                         # (N, Vc, HW)
    out = conv1x1(ctx, params["w_out"], params["b_out"])        # (N, Oc, HW)
    return out.reshape(N, out_channels, H, W)


def _make_params(key, in_channels, key_channels, value_channels, out_channels):
    ks = jax.random.split(key, 10)
    return {
        "w_key": 0.2 * jax.random.normal(ks[0], (key_channels, in_channels), jnp.float32),
        "b_key": 0.1 * jax.random.normal(ks[1], (key_channels,), jnp.float32),
        "bn_gamma": 1.0 + 0.1 * jax.random.normal(ks[2], (key_channels,), jnp.float32),
        "bn_beta": 0.1 * jax.random.normal(ks[3], (key_channels,), jnp.float32),
        "bn_mean": 0.1 * jax.random.normal(ks[4], (key_channels,), jnp.float32),
        "bn_var": 1.0 + 0.1 * jnp.abs(jax.random.normal(ks[5], (key_channels,), jnp.float32)),
        "w_value": 0.2 * jax.random.normal(ks[6], (value_channels, in_channels), jnp.float32),
        "b_value": 0.1 * jax.random.normal(ks[7], (value_channels,), jnp.float32),
        # PyTorch __init__ zero-inits W; use non-zero deterministic values here.
        "w_out": 0.2 * jax.random.normal(ks[8], (out_channels, value_channels), jnp.float32),
        "b_out": 0.1 * jax.random.normal(ks[9], (out_channels,), jnp.float32),
    }


if __name__ == "__main__":
    N, C, H, W = 2, 4, 16, 16
    Kc, Vc = 8, 8
    Oc = C  # out_channels=None -> in_channels

    root = jax.random.PRNGKey(0)
    kx, kp = jax.random.split(root)
    x = jax.random.normal(kx, (N, C, H, W), jnp.float32)
    params = _make_params(kp, C, Kc, Vc, Oc)

    ref = _reference(x, params, key_channels=Kc, value_channels=Vc,
                     out_channels=Oc)

    # tq=tk=128 so the online-softmax (multi kv-tile) path is exercised at HW=256.
    # Run both the VMEM KV-cache path and the recompute path.
    for use_cache in (True, False):
        out = self_attention_block(x, params, key_channels=Kc, value_channels=Vc,
                                   out_channels=Oc, tq=128, tk=128,
                                   cache_kv=use_cache)
        out = jax.block_until_ready(out)
        assert out.shape == (N, Oc, H, W)
        # bf16 MXU operands + approximate reciprocal => looser tolerance than pure f32.
        err = jnp.max(jnp.abs(out - ref))
        assert err < 3e-2, f"mismatch vs pure-JAX reference (cache_kv={use_cache}): {err}"

    print("KERNEL_OK")
</pallas_src>

<mosaic_0001>
module attributes {stable_mosaic.version = 11 : i64} {
  func.func @_self_attn_kernel(%arg0: i32, %arg1: i32, %arg2: i32, %arg3: memref<1x4x128xbf16, #tpu.memory_space<vmem>>, %arg4: memref<1x4x128xbf16, #tpu.memory_space<vmem>>, %arg5: memref<16x4xbf16, #tpu.memory_space<vmem>>, %arg6: memref<16x1xf32, #tpu.memory_space<vmem>>, %arg7: memref<4x8xbf16, #tpu.memory_space<vmem>>, %arg8: memref<4x1xf32, #tpu.memory_space<vmem>>, %arg9: memref<1x4x128xf32, #tpu.memory_space<vmem>>, %arg10: memref<8x128xbf16, #tpu.memory_space<vmem>>, %arg11: memref<16x256xbf16, #tpu.memory_space<vmem>>, %arg12: memref<1x128xf32, #tpu.memory_space<vmem>>, %arg13: memref<1x128xf32, #tpu.memory_space<vmem>>, %arg14: memref<8x128xf32, #tpu.memory_space<vmem>>) attributes {dimension_semantics = [#tpu.dimension_semantics<parallel>, #tpu.dimension_semantics<arbitrary>, #tpu.dimension_semantics<arbitrary>], iteration_bounds = array<i64: 2, 2, 2>, scalar_prefetch = 0 : i64, scratch_operands = 5 : i64, tpu.core_type = #tpu.core_type<tc>, window_params = [{transform_indices = @transform_0, window_bounds = array<i64: 1, 4, 128>}, {transform_indices = @transform_1, window_bounds = array<i64: 1, 4, 128>}, {pipeline_mode = #tpu.pipeline_mode<synchronous>, transform_indices = @transform_2, window_bounds = array<i64: 16, 4>}, {pipeline_mode = #tpu.pipeline_mode<synchronous>, transform_indices = @transform_3, window_bounds = array<i64: 16, 1>}, {pipeline_mode = #tpu.pipeline_mode<synchronous>, transform_indices = @transform_4, window_bounds = array<i64: 4, 8>}, {pipeline_mode = #tpu.pipeline_mode<synchronous>, transform_indices = @transform_5, window_bounds = array<i64: 4, 1>}, {transform_indices = @transform_6, window_bounds = array<i64: 1, 4, 128>}]} {
    %c0 = arith.constant 0 : index
    %c0_0 = arith.constant 0 : index
    %0 = vector.load %arg5[%c0, %c0_0] : memref<16x4xbf16, #tpu.memory_space<vmem>>, vector<16x4xbf16>
    %c0_1 = arith.constant 0 : index
    %c0_2 = arith.constant 0 : index
    %1 = vector.load %arg6[%c0_1, %c0_2] : memref<16x1xf32, #tpu.memory_space<vmem>>, vector<16x1xf32>
    %c0_i32 = arith.constant 0 : i32
    %2 = arith.cmpi eq, %arg2, %c0_i32 : i32
    %3 = arith.extui %2 : i1 to i32
    %c0_i32_3 = arith.constant 0 : i32
    %4 = arith.cmpi ne, %3, %c0_i32_3 : i32
    scf.if %4 {
      %cst_25 = arith.constant 0xFF800000 : f32
      %42 = vector.broadcast %cst_25 : f32 to vector<1x128xf32>
      %c0_26 = arith.constant 0 : index
      %c0_27 = arith.constant 0 : index
      %43 = vector.load %arg12[%c0_26, %c0_27] : memref<1x128xf32, #tpu.memory_space<vmem>>, vector<1x128xf32>
      tpu.vector_store %arg12[%c0_26, %c0_27], %42 {strides = array<i32>} : memref<1x128xf32, #tpu.memory_space<vmem>>, vector<1x128xf32>,
      %cst_28 = arith.constant 0.000000e+00 : f32
      %44 = vector.broadcast %cst_28 : f32 to vector<1x128xf32>
      %c0_29 = arith.constant 0 : index
      %c0_30 = arith.constant 0 : index
      %45 = vector.load %arg13[%c0_29, %c0_30] : memref<1x128xf32, #tpu.memory_space<vmem>>, vector<1x128xf32>
      tpu.vector_store %arg13[%c0_29, %c0_30], %44 {strides = array<i32>} : memref<1x128xf32, #tpu.memory_space<vmem>>, vector<1x128xf32>,
      %cst_31 = arith.constant 0.000000e+00 : f32
      %46 = vector.broadcast %cst_31 : f32 to vector<8x128xf32>
      %c0_32 = arith.constant 0 : index
      %c0_33 = arith.constant 0 : index
      %47 = vector.load %arg14[%c0_32, %c0_33] : memref<8x128xf32, #tpu.memory_space<vmem>>, vector<8x128xf32>
      tpu.vector_store %arg14[%c0_32, %c0_33], %46 {strides = array<i32>} : memref<8x128xf32, #tpu.memory_space<vmem>>, vector<8x128xf32>,
      %48 = vector.extract_strided_slice %0 {offsets = [0, 0], sizes = [8, 4], strides = [1, 1]} : vector<16x4xbf16> to vector<8x4xbf16>
      %c0_34 = arith.constant 0 : index
      %c0_35 = arith.constant 0 : index
      %c0_36 = arith.constant 0 : index
      %49 = vector.load %arg3[%c0_34, %c0_35, %c0_36] : memref<1x4x128xbf16, #tpu.memory_space<vmem>>, vector<1x4x128xbf16>
      %50 = vector.shape_cast %49 : vector<1x4x128xbf16> to vector<4x128xbf16>
      %cst_37 = arith.constant dense<0.000000e+00> : vector<8x128xf32>
      %51 = tpu.matmul %48, %50, %cst_37 {dimension_numbers = #tpu.dot_dimension_numbers<[1], [0], [0], [1], [0, 0, 1, 1], [], []>} : vector<8x4xbf16>, vector<4x128xbf16>, vector<8x128xf32> -> vector<8x128xf32>
      %52 = vector.extract_strided_slice %1 {offsets = [0, 0], sizes = [8, 1], strides = [1, 1]} : vector<16x1xf32> to vector<8x1xf32>
      %53 = vector.broadcast %52 : vector<8x1xf32> to vector<8x128xf32>
      %54 = arith.addf %51, %53 : vector<8x128xf32>
      %cst_38 = arith.constant 0.353553385 : f32
      %55 = vector.broadcast %cst_38 : f32 to vector<8x128xf32>
      %56 = arith.mulf %54, %55 : vector<8x128xf32>
      %57 = arith.truncf %56 : vector<8x128xf32> to vector<8x128xbf16>
      %c0_39 = arith.constant 0 : index
      %c0_40 = arith.constant 0 : index
      %58 = vector.load %arg10[%c0_39, %c0_40] : memref<8x128xbf16, #tpu.memory_space<vmem>>, vector<8x128xbf16>
      tpu.vector_store %arg10[%c0_39, %c0_40], %57 {strides = array<i32>} : memref<8x128xbf16, #tpu.memory_space<vmem>>, vector<8x128xbf16>,
    } else {
    }
    %c128_i32 = arith.constant 128 : i32
    %5 = arith.muli %arg2, %c128_i32 : i32
    %6 = tpu.assume_multiple %5, 128 : i32
    %c0_i32_4 = arith.constant 0 : i32
    %7 = arith.cmpi eq, %arg1, %c0_i32_4 : i32
    %8 = arith.extui %7 : i1 to i32
    %c0_i32_5 = arith.constant 0 : i32
    %9 = arith.cmpi ne, %8, %c0_i32_5 : i32
    scf.if %9 {
      %c0_25 = arith.constant 0 : index
      %c0_26 = arith.constant 0 : index
      %c0_27 = arith.constant 0 : index
      %42 = vector.load %arg4[%c0_25, %c0_26, %c0_27] : memref<1x4x128xbf16, #tpu.memory_space<vmem>>, vector<1x4x128xbf16>
      %43 = vector.shape_cast %42 : vector<1x4x128xbf16> to vector<4x128xbf16>
      %cst_28 = arith.constant dense<0.000000e+00> : vector<16x128xf32>
      %44 = tpu.matmul %0, %43, %cst_28 {dimension_numbers = #tpu.dot_dimension_numbers<[1], [0], [0], [1], [0, 0, 1, 1], [], []>} : vector<16x4xbf16>, vector<4x128xbf16>, vector<16x128xf32> -> vector<16x128xf32>
      %45 = vector.broadcast %1 : vector<16x1xf32> to vector<16x128xf32>
      %46 = arith.addf %44, %45 : vector<16x128xf32>
      %47 = arith.truncf %46 : vector<16x128xf32> to vector<16x128xbf16>
      %c0_29 = arith.constant 0 : index
      %48 = arith.index_cast %6 : i32 to index
      %49 = vector.load %arg11[%c0_29, %48] : memref<16x256xbf16, #tpu.memory_space<vmem>>, vector<16x128xbf16>
      tpu.vector_store %arg11[%c0_29, %48], %47 {strides = array<i32>} : memref<16x256xbf16, #tpu.memory_space<vmem>>, vector<16x128xbf16>,
    } else {
    }
    %c0_6 = arith.constant 0 : index
    %10 = arith.index_cast %6 : i32 to index
    %11 = vector.load %arg11[%c0_6, %10] : memref<16x256xbf16, #tpu.memory_space<vmem>>, vector<16x128xbf16>
    %c0_7 = arith.constant 0 : index
    %c0_8 = arith.constant 0 : index
    %12 = vector.load %arg10[%c0_7, %c0_8] : memref<8x128xbf16, #tpu.memory_space<vmem>>, vector<8x128xbf16>
    %13 = vector.extract_strided_slice %11 {offsets = [0, 0], sizes = [8, 128], strides = [1, 1]} : vector<16x128xbf16> to vector<8x128xbf16>
    %14 = vector.extract_strided_slice %11 {offsets = [8, 0], sizes = [8, 128], strides = [1, 1]} : vector<16x128xbf16> to vector<8x128xbf16>
    %cst = arith.constant dense<0.000000e+00> : vector<128x128xf32>
    %15 = tpu.matmul %13, %12, %cst {dimension_numbers = #tpu.dot_dimension_numbers<[0], [0], [1], [1], [0, 1, 1, 1], [], []>} : vector<8x128xbf16>, vector<8x128xbf16>, vector<128x128xf32> -> vector<128x128xf32>
    %c0_9 = arith.constant 0 : index
    %c0_10 = arith.constant 0 : index
    %16 = vector.load %arg12[%c0_9, %c0_10] : memref<1x128xf32, #tpu.memory_space<vmem>>, vector<1x128xf32>
    %cst_11 = arith.constant dense<0xFF800000> : vector<128xf32>
    %17 = vector.multi_reduction <maximumf>, %15, %cst_11 [0] : vector<128x128xf32> to vector<128xf32>
    %18 = vector.shape_cast %17 : vector<128xf32> to vector<1x128xf32>
    %19 = arith.maximumf %16, %18 : vector<1x128xf32>
    %20 = arith.subf %16, %19 : vector<1x128xf32>
    %21 = math.exp %20 : vector<1x128xf32>
    %22 = vector.broadcast %19 : vector<1x128xf32> to vector<128x128xf32>
    %23 = arith.subf %15, %22 : vector<128x128xf32>
    %24 = math.exp %23 : vector<128x128xf32>
    %c0_12 = arith.constant 0 : index
    %c0_13 = arith.constant 0 : index
    %25 = vector.load %arg13[%c0_12, %c0_13] : memref<1x128xf32, #tpu.memory_space<vmem>>, vector<1x128xf32>
    %26 = arith.mulf %21, %25 : vector<1x128xf32>
    %cst_14 = arith.constant dense<0.000000e+00> : vector<128xf32>
    %27 = vector.multi_reduction <add>, %24, %cst_14 [0] : vector<128x128xf32> to vector<128xf32>
    %28 = vector.shape_cast %27 : vector<128xf32> to vector<1x128xf32>
    %29 = arith.addf %26, %28 : vector<1x128xf32>
    %c0_15 = arith.constant 0 : index
    %c0_16 = arith.constant 0 : index
    %30 = vector.load %arg13[%c0_15, %c0_16] : memref<1x128xf32, #tpu.memory_space<vmem>>, vector<1x128xf32>
    tpu.vector_store %arg13[%c0_15, %c0_16], %29 {strides = array<i32>} : memref<1x128xf32, #tpu.memory_space<vmem>>, vector<1x128xf32>,
    %31 = arith.truncf %24 : vector<128x128xf32> to vector<128x128xbf16>
    %cst_17 = arith.constant dense<0.000000e+00> : vector<8x128xf32>
    %32 = tpu.matmul %14, %31, %cst_17 {dimension_numbers = #tpu.dot_dimension_numbers<[1], [0], [0], [1], [0, 0, 1, 1], [], []>} : vector<8x128xbf16>, vector<128x128xbf16>, vector<8x128xf32> -> vector<8x128xf32>
    %c0_18 = arith.constant 0 : index
    %c0_19 = arith.constant 0 : index
    %33 = vector.load %arg14[%c0_18, %c0_19] : memref<8x128xf32, #tpu.memory_space<vmem>>, vector<8x128xf32>
    %34 = vector.broadcast %21 : vector<1x128xf32> to vector<8x128xf32>
    %35 = arith.mulf %34, %33 : vector<8x128xf32>
    %36 = arith.addf %35, %32 : vector<8x128xf32>
    %c0_20 = arith.constant 0 : index
    %c0_21 = arith.constant 0 : index
    %37 = vector.load %arg14[%c0_20, %c0_21] : memref<8x128xf32, #tpu.memory_space<vmem>>, vector<8x128xf32>
    tpu.vector_store %arg14[%c0_20, %c0_21], %36 {strides = array<i32>} : memref<8x128xf32, #tpu.memory_space<vmem>>, vector<8x128xf32>,
    %c0_22 = arith.constant 0 : index
    %c0_23 = arith.constant 0 : index
    %38 = vector.load %arg12[%c0_22, %c0_23] : memref<1x128xf32, #tpu.memory_space<vmem>>, vector<1x128xf32>
    tpu.vector_store %arg12[%c0_22, %c0_23], %19 {strides = array<i32>} : memref<1x128xf32, #tpu.memory_space<vmem>>, vector<1x128xf32>,
    %c1_i32 = arith.constant 1 : i32
    %39 = arith.cmpi eq, %arg2, %c1_i32 : i32
    %40 = arith.extui %39 : i1 to i32
    %c0_i32_24 = arith.constant 0 : i32
    %41 = arith.cmpi ne, %40, %c0_i32_24 : i32
    scf.if %41 {
      %c0_25 = arith.constant 0 : index
      %c0_26 = arith.constant 0 : index
      %42 = vector.load %arg13[%c0_25, %c0_26] : memref<1x128xf32, #tpu.memory_space<vmem>>, vector<1x128xf32>
      %43 = tpu.reciprocal %42 {approx = true} : vector<1x128xf32> -> vector<1x128xf32>
      %c0_27 = arith.constant 0 : index
      %c0_28 = arith.constant 0 : index
      %44 = vector.load %arg14[%c0_27, %c0_28] : memref<8x128xf32, #tpu.memory_space<vmem>>, vector<8x128xf32>
      %45 = vector.broadcast %43 : vector<1x128xf32> to vector<8x128xf32>
      %46 = arith.mulf %44, %45 : vector<8x128xf32>
      %47 = arith.truncf %46 : vector<8x128xf32> to vector<8x128xbf16>
      %c0_29 = arith.constant 0 : index
      %c0_30 = arith.constant 0 : index
      %48 = vector.load %arg7[%c0_29, %c0_30] : memref<4x8xbf16, #tpu.memory_space<vmem>>, vector<4x8xbf16>
      %cst_31 = arith.constant dense<0.000000e+00> : vector<4x128xf32>
      %49 = tpu.matmul %48, %47, %cst_31 {dimension_numbers = #tpu.dot_dimension_numbers<[1], [0], [0], [1], [0, 0, 1, 1], [], []>} : vector<4x8xbf16>, vector<8x128xbf16>, vector<4x128xf32> -> vector<4x128xf32>
      %c0_32 = arith.constant 0 : index
      %c0_33 = arith.constant 0 : index
      %50 = vector.load %arg8[%c0_32, %c0_33] : memref<4x1xf32, #tpu.memory_space<vmem>>, vector<4x1xf32>
      %51 = vector.broadcast %50 : vector<4x1xf32> to vector<4x128xf32>
      %52 = arith.addf %49, %51 : vector<4x128xf32>
      %c0_34 = arith.constant 0 : index
      %c0_35 = arith.constant 0 : index
      %c0_36 = arith.constant 0 : index
      %53 = vector.load %arg9[%c0_34, %c0_35, %c0_36] : memref<1x4x128xf32, #tpu.memory_space<vmem>>, vector<1x4x128xf32>
      %54 = vector.shape_cast %53 : vector<1x4x128xf32> to vector<4x128xf32>
      %55 = vector.shape_cast %52 : vector<4x128xf32> to vector<1x4x128xf32>
      tpu.vector_store %arg9[%c0_34, %c0_35, %c0_36], %55 {strides = array<i32>} : memref<1x4x128xf32, #tpu.memory_space<vmem>>, vector<1x4x128xf32>,
    } else {
    }
    return
  }
  func.func @transform_0(%arg0: i32, %arg1: i32, %arg2: i32) -> (i32, i32, i32) {
    %c0_i32 = arith.constant 0 : i32
    %c0_i32_0 = arith.constant 0 : i32
    return %arg0, %c0_i32, %arg1 : i32, i32, i32
  }
  func.func @transform_1(%arg0: i32, %arg1: i32, %arg2: i32) -> (i32, i32, i32) {
    %c0_i32 = arith.constant 0 : i32
    %c0_i32_0 = arith.constant 0 : i32
    return %arg0, %c0_i32, %arg2 : i32, i32, i32
  }
  func.func @transform_2(%arg0: i32, %arg1: i32, %arg2: i32) -> (i32, i32) {
    %c0_i32 = arith.constant 0 : i32
    %c0_i32_0 = arith.constant 0 : i32
    %c0_i32_1 = arith.constant 0 : i32
    return %c0_i32, %c0_i32_0 : i32, i32
  }
  func.func @transform_3(%arg0: i32, %arg1: i32, %arg2: i32) -> (i32, i32) {
    %c0_i32 = arith.constant 0 : i32
    %c0_i32_0 = arith.constant 0 : i32
    %c0_i32_1 = arith.constant 0 : i32
    return %c0_i32, %c0_i32_0 : i32, i32
  }
  func.func @transform_4(%arg0: i32, %arg1: i32, %arg2: i32) -> (i32, i32) {
    %c0_i32 = arith.constant 0 : i32
    %c0_i32_0 = arith.constant 0 : i32
    %c0_i32_1 = arith.constant 0 : i32
    return %c0_i32, %c0_i32_0 : i32, i32
  }
  func.func @transform_5(%arg0: i32, %arg1: i32, %arg2: i32) -> (i32, i32) {
    %c0_i32 = arith.constant 0 : i32
    %c0_i32_0 = arith.constant 0 : i32
    %c0_i32_1 = arith.constant 0 : i32
    return %c0_i32, %c0_i32_0 : i32, i32
  }
  func.func @transform_6(%arg0: i32, %arg1: i32, %arg2: i32) -> (i32, i32, i32) {
    %c0_i32 = arith.constant 0 : i32
    %c0_i32_0 = arith.constant 0 : i32
    return %arg0, %c0_i32, %arg1 : i32, i32, i32
  }
}

</mosaic_0001>

<bundles_post_ra>
// kernel: tpu_custom_call.1
= control target key start
LH: loop header
LB: loop body
LE: loop exit
PB: predicated region body
PF: predicated region fallthrough
CT: control target
= control target key end

     0   :  { %s1633_s0 = inlined_call_operand.vmem [shape: bf16[2,4,256], index: 0, kind: input, shape index: {}]   ;;  %s1634_s1 = inlined_call_operand.vmem [shape: bf16[2,4,256], index: 1, kind: input, shape index: {}]   ;;  %s1635_s2 = inlined_call_operand.vmem [shape: bf16[16,4], index: 2, kind: input, shape index: {}]   ;;  %s1636_s3 = inlined_call_operand.vmem [shape: f32[16,1], index: 3, kind: input, shape index: {}]   ;;  %s1637_s4 = inlined_call_operand.vmem [shape: bf16[4,8], index: 4, kind: input, shape index: {}]   ;;  %s1638_s5 = inlined_call_operand.vmem [shape: f32[4,1], index: 5, kind: input, shape index: {}]   ;;  %s1639_s6 = inlined_call_operand.hbm [shape: f32[2,4,256], index: 6, kind: output, shape index: {}]  }
   0x1   :  { %1647 = sst [smem:[#allocation18_spill]] %s1635_s2 }
   0x2   :  { %11 = vsyncpa [#allocation8], 0 }
   0x3   :  { %13 = vsyncpa [#allocation8 + $0x1], 0  ;;  %s1377_s21 = smov 0   ;;  %s1379_s22 = smov 0  }
   0x4   :  { %s1381_s23 = smov 0   ;;  %s1383_s24 = smov 0  }
   0x5   :  { %s1385_s25 = smov 0   ;;  %s1387_s26 = smov 0  }
   0x6   :  { %s1389_s27 = smov 0   ;;  %s1391_s28 = smov 0  }
   0x7   :  { %s1393_s29 = smov 0   ;;  %s1395_s30 = smov 0  }
   0x8 LB: > { %1648 = sst [smem:[#allocation10_spill]] %s1299_s23  ;;  %s964_s7 = sadd.s32 4294967295, %s1327_s30   ;;  %s1327_s30 = sphi %s1395_s30, %s19_s30   ;;  %s1323_s29 = sphi %s1393_s29, %s1667_s29   ;;  %s1319_s28 = sphi %s1391_s28, %s1666_s28   ;;  %s1315_s27 = sphi %s1389_s27, %s1665_s27   ;;  %s1311_s26 = sphi %s1387_s26, %s1664_s26   ;;  %s1307_s25 = sphi %s1385_s25, %s1663_s25   ;;  %s1303_s24 = sphi %s1383_s24, %s1662_s24   ;;  %s1299_s23 = sphi %s1381_s23, %s1661_s23   ;;  %s1295_s22 = sphi %s1379_s22, %s1669_s22   ;;  %s1291_s21 = sphi %s1377_s21, %s1668_s21  }
   0x9   : > { %1649 = sst [smem:[#allocation11_spill]] %s1315_s27  ;;  %s965_s8 = sadd.s32 4294967294, %s1327_s30  }
   0xa   : > { %1650 = sst [smem:[#allocation12_spill]] %s1319_s28  ;;  %s31_s9 = sadd.s32 1, %s1315_s27 }
   0xb   : > { %1651 = sst [smem:[#allocation13_spill]] %s1323_s29  ;;  %p32_p0 = scmp.ge.s32.totalorder %s31_s9, 2 }
   0xc   : > { %s34_s10 = sadd.s32 1, %s1319_s28  ;;  %s38_s11 = sadd.s32 1, %s1323_s29 }
   0xd   : > { %p197_p1 = scmp.ne.s32.totalorder %s1299_s23, %s1295_s22  ;;  %s1671_s9 = smov (%p32_p0, %s31_s9), 0 }
   0xe   : > { %1652 = sst [smem:[#allocation14_spill]] %s1671_s9  ;;  %s1673_s10 = smov (!%p32_p0, %s34_s10), %s1319_s28 }
   0xf   : > { %p198_p2 = scmp.eq.s32.totalorder %s964_s7, 7  ;;  %p203_p3 = scmp.ne.s32.totalorder %s1295_s22, %s1291_s21 }
  0x10   : > { %p36_p4 = scmp.ge.s32.totalorder %s1673_s10, 2  ;;  %p204_p5 = scmp.eq.s32.totalorder %s965_s8, 7 }
  0x11   : > { %p1439_p6 = por %p198_p2, %p197_p1  ;;  %p968_p8 = scmp.ge.s32.totalorder %s1327_s30, 1 }
  0x12   : > { %s1675_s10 = smov (%p36_p4, %s1673_s10), 0  ;;  %s1677_s11 = smov (!%p36_p4, %s38_s11), %s1323_s29 }
  0x13   : > { %1654 = sst [smem:[#allocation15_spill]] %s1675_s10  ;;  %p1446_p7 = por %p204_p5, %p203_p3 }
  0x14   : > { %p40_p9 = scmp.ge.s32.totalorder %s1677_s11, 2  ;;  %p256_p10 = scmp.lt.s32.totalorder %s1327_s30, 9 }
  0x15   : > { %s183_s14 = ssub.s32 %s1319_s28, %s1675_s10  ;;  %s187_s17 = sadd.s32 1, %s1299_s23 }
  0x16   : > { %s1679_s11 = smov (%p40_p9, %s1677_s11), 0  ;;  %p257_p11 = pnand %p968_p8, %p256_p10 }
  0x17   : > { %1656 = sst [smem:[#allocation16_spill]] %s1679_s11  ;;  %s182_s15 = ssub.s32 %s1323_s29, %s1679_s11  ;;  %v316_v2 = vld [vmem:[%s1636_s3] sm:$0xff] (!%p257_p11)  ;;  %v317_v3 = vld [vmem:[%s1636_s3 + $0x8] sm:$0xff] (!%p257_p11) }
  0x18   : > { %s184_s16 = sor.u32 %s183_s14, %s182_s15  ;;  %260 = sbr.rel (%p257_p11) target bundleno = 1383 (0x567), region = 44 }
  0x19   : > { %p185_p12 = scmp.eq.s32.totalorder %s184_s16, 0  ;;  %s1643_s19 = sand.u32 (!%p257_p11), 1, %s1295_s22  }
  0x1a   : > { %p297_p13 = scmp.lt.s32.totalorder (!%p257_p11), %s1311_s26, 1  ;;  %s1658_s2 = sld [smem:[#allocation18_spill]] (!%p257_p11) }
  0x1b   : > { %s1460_s18 = scalar_select %p185_p12, %s1299_s23, %s187_s17  }
  0x1c   : > { %s1476_s15 = sshll.u32 (!%p257_p11), %s1643_s19, 2  ;;  %p299_p0 = scmp.lt.s32.totalorder (!%p257_p11), %s1307_s25, 1 }
  0x1d   : > { %1657 = sst [smem:[#allocation17_spill]] %s1460_s18  ;;  %p307_p1 = scmp.lt.s32.totalorder (!%p257_p11), %s1303_s24, 1 }
  0x1e   : > { %s296_s10 = scalar_lea.vmem (!%p257_p11), [#allocation7], %s1476_s15  ;;  %p974_p2 = scmp.ne.s32.totalorder (!%p257_p11), %s1303_s24, 0 }
  0x1f   : > { %s298_s20 = scalar_select %p297_p13, %s1311_s26, 1 }
  0x20   : > { %v1467_v0 = vld [vmem:[%s1658_s2] sm:$0xf]  ;;  %v1472_v1 = vld [vmem:[%s1658_s2 + $0x4] sm:$0xf]  ;;  %s300_s7 = scalar_select %p299_p0, %s1307_s25, 1 }
  0x21   : > { %s970_s9 = sshll.u32 %s298_s20, 1  ;;  %vm335_vm0 = vcmask (!%p974_p2), 1041408   ;;  %v1329_v5 = vmov (!%p974_p2), -inf   ;;  %v1330_v6 = vmov (!%p974_p2), 0.0   ;;  %vm1331_vm1 = vmmov (!%p974_p2), 0  }
  0x22   : > { %s302_s8 = sadd.s32 %s970_s9, %s300_s7  ;;  %322 = vst [vmem:[#allocation4] sm:$0x1] (!%p974_p2), %v1329_v5  ;;  %323 = vst [vmem:[#allocation5] sm:$0x1] (!%p974_p2), %v1330_v6  ;;  %1021 = vmatprep.subr.bf16.mxu0 (!%p974_p2), %v1330_v6  ;;  %1023 = vmatprep.mubr.msk.bf16.mxu0 (!%p974_p2), %vm1331_vm1, %v1330_v6  ;;  %vm331_vm2 = vcmask (!%p974_p2), 31744   ;;  %v1332_v8 = vmov (!%p974_p2), 0  }
  0x23   : > { %s971_s14 = sshll.u32 %s302_s8, 1  ;;  %321 = sbr.rel (%p974_p2) target bundleno = 262 (0x106), region = 48  ;;  %324 = vst [vmem:[#allocation6] sm:$0xff] (!%p974_p2), %v1330_v6  ;;  %1178 = vset.pattern.permute.xlu0 (!%p974_p2), %v1332_v8 }
  0x24   : > { %s304_s19 = scalar_lea.vmem %s1633_s0, %s971_s14  ;;  %328 = vperm.xlu0 (!%p974_p2), %1178, %v316_v2  }
  0x25   : > { %s308_s28 = scalar_select %p307_p1, %s1303_s24, 1 }
  0x26   : > { %v325_v4 = vld [vmem:[%s304_s19] sm:$0x3] (!%p974_p2) }
  0x27   : > { %s310_s27 = sadd.s32 %s970_s9, %s308_s28  ;;  %v337_v7 = vsel (!%p974_p2), %vm335_vm0, %v325_v4, 0 }
  0x28   : > { %s973_s18 = sshll.u32 %s310_s27, 1  ;;  %1022 = vmatpush3.bf16.msra.mxu0 (!%p974_p2), %v337_v7 }
  0x29   : > { %s1495_s17 = scalar_lea.vmem %s1634_s1, %s973_s18 }
  0x2b   : > { %1024 = vmatmul.mubr.msk.bf16.vlgmr.msra.gmra.mrb[0].mxu0 %vm331_vm2, %v1467_v0 }
  0xa3   : > { %v329_v9 = vpop.permute.xlu0 %328 }
  0xfe   : > { %v373_v10 = vpop.f32.mrb[0].mxu0 }
  0xff   : > { %v374_v11 = vadd.f32 %v373_v10, %v329_v9  ;;  %v1025_v12 = vpop.f32.mrb[1].mxu0 }
 0x100   : > { %v376_v13 = vpop.f32.mrb[2].mxu0 }
 0x101   : > { %v379_v14 = vmul.f32 0.35355338, %v374_v11  ;;  %v1026_v15 = vpop.f32.mrb[3].mxu0 }
 0x103   : > { %v380_v16 = vpack.c.bf16 %v379_v14, %v379_v14 }
 0x105   : > { %381 = vst [vmem:[#allocation2] sm:$0xf] %v380_v16 }
 0x106 PF: > { %s976_s2 = sshll.u32 %s1303_s24, 7  ;;  %p977_p3 = scmp.ne.s32.totalorder %s1307_s25, 0 }
 0x107   : > { %v387_v17 = vld [vmem:[%s1495_s17] sm:$0x3] (!%p977_p3)  ;;  %vm407_vm3 = vcmask (!%p977_p3), 1041408   ;;  %v1333_v18 = vmov (!%p977_p3), 0.0   ;;  %vm1334_vm4 = vmmov (!%p977_p3), 0   ;;  %v978_v20 = vcombine.low (!%p977_p3), %v1467_v0, %v1472_v1  ;;  %s453_s23 = sshra.s32 (!%p977_p3), %s976_s2, 7 }
 0x108   : > { %386 = sbr.rel (%p977_p3) target bundleno = 487 (0x1e7), region = 52  ;;  %1027 = vmatprep.subr.bf16.mxu0 (!%p977_p3), %v1333_v18  ;;  %v409_v19 = vsel (!%p977_p3), %vm407_vm3, %v387_v17, 0  ;;  %1029 = vmatprep.mubr.msk.bf16.mxu0 (!%p977_p3), %vm1334_vm4, %v1333_v18  ;;  %vm403_vm5 = vcmask (!%p977_p3), 31744   ;;  %v1335_v21 = vmov (!%p977_p3), 0   ;;  %s980_s27 = sshll.u32 (!%p977_p3), %s453_s23, 3 }
 0x109   : > { %1028 = vmatpush3.bf16.msra.mxu0 (!%p977_p3), %v409_v19  ;;  %1179 = vset.pattern.permute.xlu0 (!%p977_p3), %v1335_v21  ;;  %s456_s28 = scalar_lea.vmem (!%p977_p3), [#allocation3], %s980_s27 }
 0x10a   : > { %390 = vperm.xlu0 (!%p977_p3), %1179, %v316_v2  }
 0x10c   : > { %1030 = vmatmul.mubr.msk.bf16.vlgmr.msra.gmra.mrb[0].mxu0 (!%p977_p3), %vm403_vm5, %v978_v20 }
 0x10e   : > { %395 = vperm.xlu0 (!%p977_p3), %1179, %v317_v3  }
 0x189   : > { %v391_v22 = vpop.permute.xlu0 %390 }
 0x18d   : > { %v396_v25 = vpop.permute.xlu0 %395 }
 0x1df   : > { %v445_v23 = vpop.f32.mrb[0].mxu0 }
 0x1e0   : > { %v1031_v24 = vpop.f32.mrb[1].mxu0  ;;  %v446_v27 = vadd.f32 %v445_v23, %v391_v22 }
 0x1e1   : > { %v448_v26 = vpop.f32.mrb[2].mxu0 }
 0x1e2   : > { %v449_v28 = vadd.f32 %v448_v26, %v396_v25  ;;  %v1032_v29 = vpop.f32.mrb[3].mxu0 }
 0x1e4   : > { %v452_v30 = vpack.c.bf16 %v449_v28, %v446_v27 }
 0x1e6   : > { %457 = vst [vmem:[%s456_s28] sm:$0xff] %v452_v30 }
 0x1e7 PF: > { %s458_s29 = sshra.s32 %s976_s2, 7  ;;  %v463_v31 = vld [vmem:[#allocation2] sm:$0xf]  ;;  %vm505_vm6 = vcmask 1043456   ;;  %vm480_vm7 = vcmask 64512   ;;  %v1336_v42 = vmov 0.0   ;;  %v633_v12 = vlaneseq }
 0x1e8   : > { %s981_s9 = sshll.u32 %s458_s29, 3  ;;  %1077 = vmatprep.subr.msk.bf16.mxu0 %vm505_vm6, %v463_v31  ;;  %v507_v32 = vsel %vm505_vm6, %v463_v31, 0  ;;  %1051 = vmatprep.subr.bf16.mxu1 %v1336_v42  ;;  %vm1337_vm8 = vmmov 0   ;;  %v606_v17 = vld [vmem:[#allocation4] sm:$0x1]  ;;  %p990_p4 = scmp.ne.s32.totalorder %s1303_s24, 1 }
 0x1e9   : > { %1034 = vmatpush3.bf16.msra.mxu0 %v507_v32  ;;  %s461_s11 = scalar_lea.vmem [#allocation3], %s981_s9  ;;  %1067 = vmatprep.mubr.msk.bf16.mxu1 %vm1337_vm8, %v1336_v42  ;;  %v634_v15 = vshrl.u32 %v633_v12, 7  ;;  %vm1339_vm9 = vmmov (!%p990_p4), 0  }
 0x1eb   : > { %v1542_v19 = vsub.s32 0, %v634_v15 }
 0x1ed   : > { %v1511_v33 = vld [vmem:[%s461_s11] sm:$0xff] }
 0x1ee   : > { %464 = vxpose.xlu0.c.b16.start.end [1/1] (short) %v1511_v33, 128 }
 0x254   : > { %v472_v34 = vpop.trf.xlu0 }
 0x255   : > { %1035 = vmatprep.mubr.msk.bf16.mxu0 %vm480_vm7, %v472_v34 }
 0x258   : > { %v473_v35 = vpop.trf.xlu0 }
 0x259   : > { %1036 = vmatmul.mubr.msk.bf16.vlgmr.msra.gmra.mrb[0].mxu0 %vm480_vm7, %v473_v35 }
 0x25c   : > { %v474_v36 = vpop.trf.xlu0 }
 0x25d   : > { %1039 = vmatprep.mubr.msk.bf16.mxu0 %vm480_vm7, %v474_v36 }
 0x260   : > { %v475_v37 = vpop.trf.xlu0 }
 0x261   : > { %1040 = vmatmul.mubr.msk.bf16.gmra.mrb[4].mxu0 %vm480_vm7, %v475_v37 }
 0x264   : > { %v476_v38 = vpop.trf.xlu0 }
 0x265   : > { %1043 = vmatprep.mubr.msk.bf16.mxu0 %vm480_vm7, %v476_v38 }
 0x268   : > { %v477_v39 = vpop.trf.xlu0 }
 0x269   : > { %1044 = vmatmul.mubr.msk.bf16.gmra.mrb[8].mxu0 %vm480_vm7, %v477_v39 }
 0x26c   : > { %v478_v40 = vpop.trf.xlu0 }
 0x26d   : > { %1047 = vmatprep.mubr.msk.bf16.mxu0 %vm480_vm7, %v478_v40 }
 0x270   : > { %v479_v41 = vpop.trf.xlu0 }
 0x271   : > { %1048 = vmatmul.mubr.msk.bf16.gmra.mrb[12].mxu0 %vm480_vm7, %v479_v41 }
 0x32c   : > { %v1037_v43 = vpop.f32.mrb[0].mxu0 }
 0x32d   : > { %v543_v44 = vpop.f32.mrb[1].mxu0 }
 0x32e   : > { %v1038_v45 = vpop.f32.mrb[2].mxu0 }
 0x32f   : > { %v546_v46 = vpop.f32.mrb[3].mxu0 }
 0x334   : > { %v1524_v47 = vpop.f32.mrb[4].mxu0 }
 0x335   : > { %v609_v48 = vmax.f32 %v1037_v43, %v1524_v47  ;;  %v559_v49 = vpop.f32.mrb[5].mxu0 }
 0x336   : > { %v607_v50 = vmax.f32 %v543_v44, %v559_v49  ;;  %v1527_v51 = vpop.f32.mrb[6].mxu0 }
 0x337   : > { %v610_v52 = vmax.f32 %v1038_v45, %v1527_v51  ;;  %v562_v53 = vpop.f32.mrb[7].mxu0 }
 0x338   : > { %v608_v54 = vmax.f32 %v546_v46, %v562_v53 }
 0x33c   : > { %v1530_v55 = vpop.f32.mrb[8].mxu0 }
 0x33d   : > { %v613_v56 = vmax.f32 %v609_v48, %v1530_v55  ;;  %v575_v57 = vpop.f32.mrb[9].mxu0 }
 0x33e   : > { %v611_v58 = vmax.f32 %v607_v50, %v575_v57  ;;  %v1533_v59 = vpop.f32.mrb[10].mxu0 }
 0x33f   : > { %v614_v60 = vmax.f32 %v610_v52, %v1533_v59  ;;  %v578_v61 = vpop.f32.mrb[11].mxu0 }
 0x340   : > { %v612_v62 = vmax.f32 %v608_v54, %v578_v61 }
 0x344   : > { %v1536_v63 = vpop.f32.mrb[12].mxu0 }
 0x345   : > { %v617_v0 = vmax.f32 %v613_v56, %v1536_v63  ;;  %v591_v1 = vpop.f32.mrb[13].mxu0 }
 0x346   : > { %v615_v2 = vmax.f32 %v611_v58, %v591_v1  ;;  %v1539_v3 = vpop.f32.mrb[14].mxu0 }
 0x347   : > { %v618_v4 = vmax.f32 %v614_v60, %v1539_v3  ;;  %v594_v5 = vpop.f32.mrb[15].mxu0 }
 0x348   : > { %v616_v6 = vmax.f32 %v612_v62, %v594_v5 }
 0x349   : > { %v620_v7 = vmax.f32 %v617_v0, %v618_v4 }
 0x34a   : > { %v619_v8 = vmax.f32 %v615_v2, %v616_v6 }
 0x34c   : > { %v621_v9 = vmax.f32 %v619_v8, %v620_v7 }
 0x34e   : > { %v622_v10 = vrot.slane %v621_v9, 4 }
 0x350   : > { %v623_v11 = vmax.f32 %v621_v9, %v622_v10 }
 0x352   : > { %v624_v13 = vrot.slane %v623_v11, 2 }
 0x354   : > { %v625_v14 = vmax.f32 %v623_v11, %v624_v13 }
 0x356   : > { %v626_v16 = vrot.slane %v625_v14, 1 }
 0x358   : > { %v627_v18 = vmax.f32 %v625_v14, %v626_v16 }
 0x35a   : > { %v628_v20 = vmax.f32 %v606_v17, %v627_v18 }
 0x35c   : > { %v636_v21 = vrot.slane %v628_v20, %v1542_v19  ;;  %772 = vst [vmem:[#allocation4] sm:$0x1] %v628_v20 }
 0x35e   : > { %v638_v22 = vsub.f32 %v543_v44, %v636_v21  ;;  %v639_v23 = vsub.f32 %v546_v46, %v636_v21  ;;  %v640_v24 = vsub.f32 %v1037_v43, %v636_v21  ;;  %v641_v25 = vsub.f32 %v1038_v45, %v636_v21 }
 0x35f   : > { %v642_v26 = vsub.f32 %v559_v49, %v636_v21  ;;  %v643_v27 = vsub.f32 %v562_v53, %v636_v21  ;;  %v644_v28 = vsub.f32 %v1524_v47, %v636_v21  ;;  %v645_v29 = vsub.f32 %v1527_v51, %v636_v21 }
 0x360   : > { %v646_v30 = vsub.f32 %v575_v57, %v636_v21  ;;  %v647_v31 = vsub.f32 %v578_v61, %v636_v21  ;;  %v648_v32 = vsub.f32 %v1530_v55, %v636_v21  ;;  %v649_v34 = vsub.f32 %v1533_v59, %v636_v21 }
 0x361   : > { %v650_v35 = vsub.f32 %v591_v1, %v636_v21  ;;  %v651_v36 = vsub.f32 %v594_v5, %v636_v21  ;;  %v652_v37 = vsub.f32 %v1536_v63, %v636_v21  ;;  %v654_v38 = vmul.f32 1.442695, %v638_v22 }
 0x362   : > { %v656_v39 = vmul.f32 1.442695, %v639_v23  ;;  %v658_v40 = vmul.f32 1.442695, %v640_v24  ;;  %v660_v41 = vmul.f32 1.442695, %v641_v25  ;;  %v653_v43 = vsub.f32 %v1539_v3, %v636_v21 }
 0x363   : > { %1180 = vpow2.f32 %v654_v38  ;;  %v662_v44 = vmul.f32 1.442695, %v642_v26  ;;  %v664_v45 = vmul.f32 1.442695, %v643_v27  ;;  %v666_v46 = vmul.f32 1.442695, %v644_v28 }
 0x364   : > { %1182 = vpow2.f32 %v656_v39  ;;  %v668_v47 = vmul.f32 1.442695, %v645_v29  ;;  %v670_v48 = vmul.f32 1.442695, %v646_v30  ;;  %v672_v49 = vmul.f32 1.442695, %v647_v31 }
 0x365   : > { %1184 = vpow2.f32 %v658_v40  ;;  %v674_v50 = vmul.f32 1.442695, %v648_v32  ;;  %v676_v51 = vmul.f32 1.442695, %v649_v34  ;;  %v678_v52 = vmul.f32 1.442695, %v650_v35 }
 0x366   : > { %1186 = vpow2.f32 %v660_v41  ;;  %v629_v53 = vsub.f32 %v606_v17, %v628_v20  ;;  %v680_v54 = vmul.f32 1.442695, %v651_v36  ;;  %v682_v56 = vmul.f32 1.442695, %v652_v37 }
 0x367   : > { %1188 = vpow2.f32 %v662_v44  ;;  %v684_v58 = vmul.f32 1.442695, %v653_v43  ;;  %v720_v37 = vrot.slane %v1511_v33, 4  ;;  %v686_v43 = vld [vmem:[#allocation5] sm:$0x1] }
 0x368   : > { %1190 = vpow2.f32 %v664_v45  ;;  %v630_v62 = vmul.f32 1.442695, %v629_v53 }
 0x369   : > { %1192 = vpow2.f32 %v666_v46 }
 0x36a   : > { %1194 = vpow2.f32 %v668_v47 }
 0x36b   : > { %1196 = vpow2.f32 %v670_v48  ;;  %v762_v48 = vld [vmem:[#allocation6] sm:$0xff] }
 0x36c   : > { %1198 = vpow2.f32 %v672_v49 }
 0x36d   : > { %v1181_v55 = vpop.eup %1180  ;;  %1200 = vpow2.f32 %v674_v50 }
 0x36e   : > { %v1183_v57 = vpop.eup %1182  ;;  %1202 = vpow2.f32 %v676_v51 }
 0x36f   : > { %v1185_v59 = vpop.eup %1184  ;;  %1204 = vpow2.f32 %v678_v52  ;;  %v688_v60 = vadd.f32 %v1183_v57, %v1181_v55  ;;  %v711_v61 = vpack.c.bf16 %v1183_v57, %v1181_v55  ;;  %v789_v55 = vld [vmem:[%s1638_s5] sm:$0xf] (!%p990_p4) }
 0x370   : > { %v1187_v63 = vpop.eup %1186  ;;  %1206 = vpow2.f32 %v680_v54  ;;  %v1338_v54 = vmov (!%p990_p4), 0.0  }
 0x371   : > { %v1189_v0 = vpop.eup %1188  ;;  %1208 = vpow2.f32 %v682_v56  ;;  %v689_v1 = vadd.f32 %v1185_v59, %v688_v60  ;;  %1052 = vmatpush3.bf16.msra.mxu1 %v711_v61  ;;  %v712_v2 = vpack.c.bf16 %v1187_v63, %v1185_v59  ;;  %1071 = vmatprep.subr.bf16.mxu0 (!%p990_p4), %v1338_v54  ;;  %v1340_v56 = vmov (!%p990_p4), 0  }
 0x372   : > { %v1191_v3 = vpop.eup %1190  ;;  %1053 = vmatprep.subr.bf16.mxu1 %v1336_v42  ;;  %1210 = vpow2.f32 %v684_v58  ;;  %1073 = vmatprep.mubr.msk.bf16.mxu0 (!%p990_p4), %vm1339_vm9, %v1338_v54 }
 0x373   : > { %v1193_v4 = vpop.eup %1192  ;;  %v690_v5 = vadd.f32 %v1187_v63, %v689_v1  ;;  %v713_v6 = vpack.c.bf16 %v1191_v3, %v1189_v0  ;;  %1212 = vpow2.f32 %v630_v62  ;;  %1214 = vset.pattern.permute.xlu0 (!%p990_p4), %v1340_v56  ;;  %v788_v63 = vld [vmem:[%s1637_s4] sm:$0x3] (!%p990_p4) }
 0x374   : > { %v1195_v7 = vpop.eup %1194  ;;  %792 = vperm.xlu0 (!%p990_p4), %1214, %v789_v55  }
 0x375   : > { %v1197_v8 = vpop.eup %1196  ;;  %v691_v9 = vadd.f32 %v1189_v0, %v690_v5  ;;  %1054 = vmatpush3.bf16.msra.mxu1 %v712_v2  ;;  %v714_v10 = vpack.c.bf16 %v1195_v7, %v1193_v4 }
 0x376   : > { %v1199_v11 = vpop.eup %1198  ;;  %1055 = vmatprep.subr.bf16.mxu1 %v1336_v42 }
 0x377   : > { %v1201_v12 = vpop.eup %1200  ;;  %v692_v13 = vadd.f32 %v1191_v3, %v691_v9  ;;  %v715_v14 = vpack.c.bf16 %v1199_v11, %v1197_v8 }
 0x378   : > { %v1203_v15 = vpop.eup %1202 }
 0x379   : > { %v1205_v16 = vpop.eup %1204  ;;  %v693_v17 = vadd.f32 %v1193_v4, %v692_v13  ;;  %1056 = vmatpush3.bf16.msra.mxu1 %v713_v6  ;;  %v716_v18 = vpack.c.bf16 %v1203_v15, %v1201_v12 }
 0x37a   : > { %v1207_v20 = vpop.eup %1206  ;;  %1057 = vmatprep.subr.bf16.mxu1 %v1336_v42 }
 0x37b   : > { %v1209_v21 = vpop.eup %1208  ;;  %v694_v22 = vadd.f32 %v1195_v7, %v693_v17  ;;  %v717_v23 = vpack.c.bf16 %v1207_v20, %v1205_v16 }
 0x37c   : > { %v1211_v24 = vpop.eup %1210 }
 0x37d   : > { %v1213_v25 = vpop.eup %1212  ;;  %v695_v26 = vadd.f32 %v1197_v8, %v694_v22  ;;  %1058 = vmatpush3.bf16.msra.mxu1 %v714_v10  ;;  %v718_v27 = vpack.c.bf16 %v1211_v24, %v1209_v21 }
 0x37e   : > { %1059 = vmatprep.subr.bf16.mxu1 %v1336_v42  ;;  %v767_v28 = vrot.slane %v1213_v25, %v1542_v19  ;;  %v687_v46 = vmul.f32 %v1213_v25, %v686_v43 }
 0x37f   : > { %v696_v29 = vadd.f32 %v1199_v11, %v695_v26 }
 0x380   : > { %v769_v49 = vmul.f32 %v767_v28, %v762_v48 }
 0x381   : > { %v697_v30 = vadd.f32 %v1201_v12, %v696_v29  ;;  %1060 = vmatpush3.bf16.msra.mxu1 %v715_v14 }
 0x382   : > { %1061 = vmatprep.subr.bf16.mxu1 %v1336_v42 }
 0x383   : > { %v698_v31 = vadd.f32 %v1203_v15, %v697_v30 }
 0x385   : > { %v699_v32 = vadd.f32 %v1205_v16, %v698_v31  ;;  %1062 = vmatpush3.bf16.msra.mxu1 %v716_v18 }
 0x386   : > { %1063 = vmatprep.subr.bf16.mxu1 %v1336_v42 }
 0x387   : > { %v700_v34 = vadd.f32 %v1207_v20, %v699_v32 }
 0x389   : > { %v701_v35 = vadd.f32 %v1209_v21, %v700_v34  ;;  %1064 = vmatpush3.bf16.msra.mxu1 %v717_v23 }
 0x38a   : > { %1065 = vmatprep.subr.bf16.mxu1 %v1336_v42 }
 0x38b   : > { %v702_v36 = vadd.f32 %v1211_v24, %v701_v35 }
 0x38d   : > { %v703_v38 = vrot.slane %v702_v36, 4  ;;  %1066 = vmatpush3.bf16.msra.mxu1 %v718_v27 }
 0x38f   : > { %v704_v39 = vadd.f32 %v703_v38, %v702_v36 }
 0x390   : > { %1068 = vmatmul.mubr.bf16.vlgmr.msra.gmra.mrb[0].mxu1 %v720_v37 }
 0x391   : > { %v705_v40 = vrot.slane %v704_v39, 2 }
 0x393   : > { %v706_v41 = vadd.f32 %v705_v40, %v704_v39 }
 0x395   : > { %v707_v44 = vrot.slane %v706_v41, 1 }
 0x397   : > { %v708_v45 = vadd.f32 %v707_v44, %v706_v41 }
 0x399   : > { %v709_v47 = vadd.f32 %v708_v45, %v687_v46 }
 0x39b   : > { %710 = vst [vmem:[#allocation5] sm:$0x1] %v709_v47 }
 0x3a2   : > { %v777_v53 = vld [vmem:[#allocation5] sm:$0x1] (!%p990_p4) }
 0x3a3   : > { %1215 = vrcp.f32 (!%p990_p4), %v777_v53 }
 0x3ad   : > { %v1216_v57 = vpop.eup (!%p990_p4), %1215 }
 0x3ae   : > { %v784_v59 = vrot.slane (!%p990_p4), %v1216_v57, %v1542_v19 }
 0x3f3   : > { %v793_v0 = vpop.permute.xlu0 (!%p990_p4), %792 }
 0x460   : > { %776 = sbr.rel (%p990_p4) target bundleno = 1357 (0x54d), region = 56 }
 0x463   : > { %v756_v50 = vpop.f32.mrb[0].mxu1 }
 0x464   : > { %v770_v51 = vadd.f32 %v769_v49, %v756_v50  ;;  %v1069_v42 = vpop.f32.mrb[1].mxu1 }
 0x465   : > { %v759_v52 = vpop.f32.mrb[2].mxu1 }
 0x466   : > { %771 = vst [vmem:[#allocation6] sm:$0xff] %v770_v51  ;;  %v1070_v33 = vpop.f32.mrb[3].mxu1 }
 0x46d   : > { %v779_v58 = vld [vmem:[#allocation6] sm:$0xff] }
 0x46e   : > { %v786_v60 = vmul.f32 %v784_v59, %v779_v58 }
 0x470   : > { %v787_v61 = vpack.c.bf16 %v786_v60, %v786_v60 }
 0x472   : > { %v799_v62 = vsel %vm505_vm6, %v787_v61, 0 }
 0x473   : > { %1072 = vmatpush3.bf16.msra.mxu0 %v799_v62 }
 0x476   : > { %1074 = vmatmul.mubr.msk.bf16.vlgmr.msra.gmra.mrb[0].mxu0 %vm480_vm7, %v788_v63 }
 0x549   : > { %v835_v1 = vpop.f32.mrb[0].mxu0 }
 0x54a   : > { %v836_v2 = vadd.f32 %v835_v1, %v793_v0  ;;  %v1075_v3 = vpop.f32.mrb[1].mxu0 }
 0x54b   : > { %v838_v4 = vpop.f32.mrb[2].mxu0 }
 0x54c   : > { %841 = vst [vmem:[%s296_s10] sm:$0xf] %v836_v2  ;;  %v1076_v5 = vpop.f32.mrb[3].mxu0 }
 0x54d PF: > { %s993_s7 = sshll.u32 %s1311_s26, 1  ;;  %s858_s14 = sshll.u32 %s296_s10, 4  ;;  %s1576_s14 = int_to_ptr.vmem [resolvable:$true] %s858_s14 }
 0x54e   : > { %s854_s8 = sadd.s32 %s1307_s25, %s993_s7  ;;  %s1659_s27 = sand.u32 1, %s1295_s22  }
 0x54f   : > { %s994_s16 = sshll.u32 %s854_s8, 6  ;;  %s843_s28 = scalar_lea.sflag [#allocation8], %s1659_s27 }
 0x550   : > { %s856_s23 = scalar_lea.hbm %s1639_s6, %s994_s16  ;;  %s1217_s29 = scalar_lea.vmem %s1576_s14, 64 }
 0x551   : > { %p1218_p5 = scmp.ne.s32.totalorder %s1576_s14, %s1217_s29  ;;  %s1341_s25 = smov [#allocation7]  }
 0x552   : > { %s1221_s26 = sshll.u32 %s1341_s25, 4  ;;  %s1222_s26 = int_to_ptr.vmem [resolvable:$false] %s1221_s26 }
 0x553   : > { %p1219_p8 = pnand %p1218_p5, %p1439_p6  ;;  %s1223_s15 = scalar_lea.vmem %s1222_s26, 128 }
 0x554   : > { %p1224_p10 = scmp.lt.s32.totalorder %s1576_s14, %s1222_s26  ;;  %p1225_p11 = scmp.lt.s32.totalorder %s1223_s15, %s1217_s29 }
 0x555   : > { %p1220_p9 = pneg %p1219_p8 }
 0x556   : > { %p1226_p12 = por %p1225_p11, %p1224_p10 }
 0x558   : > { %p1227_p13 = pnand %p1226_p12, %p1220_p9 }
 0x55a   : > { %1230 = shalt.err (!%p1227_p13)
}
 0x55b   : > { %s1231_s10 = scalar_lea.hbm %s856_s23, 64  ;;  %s1235_s18 = scalar_lea.hbm %s1639_s6, 256 }
 0x55c   : > { %p1232_p0 = scmp.ne.s32.totalorder %s856_s23, %s1231_s10  ;;  %p1236_p3 = scmp.lt.u32.totalorder %s856_s23, %s1639_s6 }
 0x55d   : > { %p1237_p4 = scmp.lt.u32.totalorder %s1235_s18, %s1231_s10  ;;  %p1239_p8 = scmp.lt.u32.totalorder %s1231_s10, %s856_s23 }
 0x55e   : > { %p1233_p1 = pnand %p1232_p0, %p1439_p6 }
 0x55f   : > { %p1238_p5 = por %p1237_p4, %p1236_p3 }
 0x560   : > { %p1234_p2 = pneg %p1233_p1 }
 0x561   : > { %p1240_p10 = por %p1239_p8, %p1238_p5 }
 0x563   : > { %p1241_p9 = pnand %p1240_p10, %p1234_p2 }
 0x565   : > { %1244 = shalt.err (!%p1241_p9)
}
 0x566   : > { %1078 = dma.vmem_to_hbm [thread:$0]  (%p1439_p6), %s1576_s14, 64, %s856_s23, %s843_s28  }
 0x567 PF: > { %p1084_p11 = scmp.ge.s32.totalorder %s1327_s30, 2  ;;  %s870_s20 = sand.u32 1, %s1291_s21  }
 0x568   : > { %s871_s7 = scalar_lea.sflag [#allocation8], %s870_s20 }
 0x569   : > { %p1081_p12 = pnand %p1084_p11, %p1446_p7 }
 0x56b   : > { %1286 = dma.done.wait (!%p1081_p12), %s871_s7, 64  }
 0x56c   : > { %1288 = vsyncadd (!%p1081_p12), %s871_s7, 4294967232  ;;  %s19_s30 = sadd.s32 1, %s1327_s30   ;;  %s1660_s8 = sld [smem:[#allocation10_spill]] }
 0x56d   : > { %p16_p13 = scmp.ge.s32.totalorder %s19_s30, 10   ;;  %s1661_s23 = sld [smem:[#allocation17_spill]] }
 0x56e   : > { %s1662_s24 = sld [smem:[#allocation11_spill]]  ;;  %s1663_s25 = sld [smem:[#allocation12_spill]] }
 0x56f   : > { %s1664_s26 = sld [smem:[#allocation13_spill]]  ;;  %s1665_s27 = sld [smem:[#allocation14_spill]] }
 0x570   : > { %s1666_s28 = sld [smem:[#allocation15_spill]]  ;;  %s1667_s29 = sld [smem:[#allocation16_spill]] }
 0x571   : > { %s1668_s21 = smov %s1295_s22  ;;  %18 = sbr.rel (!%p16_p13) target bundleno = 8 (0x8), region = 96 }
 0x572   : > { %s1669_s22 = smov %s1660_s8 }
 0x578   :  { %876 = vsyncpa [#allocation8], 1 }
 0x579   :  { %878 = vsyncpa [#allocation8 + $0x1], 1 }

</bundles_post_ra>
